<compile_context>
chip_gen: v7x
topology: tpu7x:2x2x1
jax: 0.10.0
libtpu: 0.0.40
codegen_flags: <defaults>
</compile_context>

<pallas_src>
import jax
import jax.numpy as jnp
from jax.experimental import pallas as pl
from jax.experimental.pallas import tpu as pltpu

_LANES = 128


def _softplus(x):
    # Numerically-stable softplus, equivalent to F.softplus (beta=1).
    return jnp.maximum(x, 0.0) + jnp.log1p(jnp.exp(-jnp.abs(x)))


def _masked(values, n_valid):
    """Zero out padded lanes. Static no-op when there is no padding."""
    if n_valid == values.shape[-1]:
        return values
    lane = jax.lax.broadcasted_iota(jnp.int32, values.shape, values.ndim - 1)
    return jnp.where(lane < n_valid, values, 0.0)


def _make_vanilla_kernel(n_fake, n_real):
    inv_fake = 1.0 / n_fake
    inv_real = 1.0 / n_real

    def kernel(fake_ref, real_ref, out_ref):
        fake = fake_ref[...].astype(jnp.float32)
        real = real_ref[...].astype(jnp.float32)
        sp_fake = _masked(_softplus(fake), n_fake)
        sp_real = _masked(_softplus(-real), n_real)
        out_ref[0, 0] = (jnp.sum(sp_fake) * inv_fake
                         + jnp.sum(sp_real) * inv_real)

    return kernel


def _make_wgan_base_kernel(n_fake, n_real):
    inv_fake = 1.0 / n_fake
    inv_real = 1.0 / n_real

    def kernel(fake_ref, real_ref, out_ref):
        fake = _masked(fake_ref[...].astype(jnp.float32), n_fake)
        real = _masked(real_ref[...].astype(jnp.float32), n_real)
        out_ref[0, 0] = jnp.sum(fake) * inv_fake - jnp.sum(real) * inv_real

    return kernel


def _lane_dense(x):
    """[B, 1] / [B] scores -> lane-dense [1, P], P a multiple of 128."""
    flat = x.reshape(-1)
    n = flat.shape[0]
    padded = -(-n // _LANES) * _LANES
    if padded != n:
        flat = jnp.pad(flat, (0, padded - n))
    return flat.reshape(1, padded), n


def _run_scalar_kernel(kernel_factory, output_fake, output_real):
    fake2d, n_fake = _lane_dense(output_fake)
    real2d, n_real = _lane_dense(output_real)
    out = pl.pallas_call(
        kernel_factory(n_fake, n_real),
        out_shape=jax.ShapeDtypeStruct((1, 1), jnp.float32),
        in_specs=[
            pl.BlockSpec(memory_space=pltpu.MemorySpace.VMEM),
            pl.BlockSpec(memory_space=pltpu.MemorySpace.VMEM),
        ],
        out_specs=pl.BlockSpec(memory_space=pltpu.MemorySpace.SMEM),
    )(fake2d, real2d)
    return out[0, 0]


def _wgan_gradient_penalty(discriminator, real_data, fake_data, key):
    # TODO(synk): the gradient penalty requires autograd through an arbitrary
    # discriminator network; it runs in plain JAX (jax.grad), not in Pallas.
    b = real_data.shape[0]
    alpha = jax.random.uniform(
        key, (b,) + (1,) * (real_data.ndim - 1), dtype=real_data.dtype)
    interp = alpha * real_data + (1.0 - alpha) * fake_data
    grads = jax.grad(lambda x: jnp.sum(discriminator(x)))(interp)
    grad_norm = jnp.sqrt(jnp.sum(grads.reshape(b, -1) ** 2, axis=1) + 1e-12)
    return jnp.mean((grad_norm - 1.0) ** 2)


def generator_loss(output_real, output_fake, *, loss="vanilla",
                   grad_penalty_weight=10.0, discriminator=None,
                   real_data=None, fake_data=None, gp_key=None):
    """JAX/Pallas equivalent of GeneratorLoss.forward.

    Args:
      output_real: discriminator scores on real data, shape [B, 1] (or [B]).
      output_fake: discriminator scores on fake data, shape [B, 1] (or [B]).
      loss: 'vanilla' or 'wgan_gp'.
      discriminator / real_data / fake_data / gp_key: required for 'wgan_gp'
        to compute the gradient penalty (plain JAX autograd).
    Returns:
      scalar float32 loss.
    """
    if loss == "vanilla":
        return _run_scalar_kernel(_make_vanilla_kernel, output_fake, output_real)
    elif loss == "wgan_gp":
        base = _run_scalar_kernel(_make_wgan_base_kernel, output_fake,
                                  output_real)
        if discriminator is None or real_data is None or fake_data is None:
            raise ValueError(
                "loss='wgan_gp' requires discriminator, real_data and "
                "fake_data to compute the gradient penalty.")
        if gp_key is None:
            gp_key = jax.random.PRNGKey(0)
        gp = _wgan_gradient_penalty(discriminator, real_data, fake_data, gp_key)
        return base + grad_penalty_weight * gp
    else:
        raise NotImplementedError(f"Unsupported loss: {loss}")


if __name__ == "__main__":
    key = jax.random.PRNGKey(0)
    k1, k2, k3, k4, k5 = jax.random.split(key, 5)

    batch = 8
    data_shape = (batch, 4, 16, 16)

    # Discriminator outputs: [B, 1] scores.
    output_real = jax.random.normal(k1, (batch, 1), dtype=jnp.float32)
    output_fake = jax.random.normal(k2, (batch, 1), dtype=jnp.float32)

    # --- vanilla branch (Pallas kernel) ---
    loss_vanilla = generator_loss(output_real, output_fake, loss="vanilla")
    loss_vanilla = jax.block_until_ready(loss_vanilla)
    ref_vanilla = (jnp.mean(jax.nn.softplus(output_fake))
                   + jnp.mean(jax.nn.softplus(-output_real)))
    assert jnp.allclose(loss_vanilla, ref_vanilla, rtol=1e-5, atol=1e-6), (
        loss_vanilla, ref_vanilla)

    # --- wgan_gp branch (Pallas base term + plain-JAX gradient penalty) ---
    real_data = jax.random.normal(k3, data_shape, dtype=jnp.float32)
    fake_data = jax.random.normal(k4, data_shape, dtype=jnp.float32)
    disc_w = jax.random.normal(k5, (4 * 16 * 16, 1), dtype=jnp.float32) * 0.01

    def toy_discriminator(x):
        return x.reshape(x.shape[0], -1) @ disc_w  # [B, 1] scores

    gp_key = jax.random.PRNGKey(42)
    loss_wgan = generator_loss(
        output_real, output_fake, loss="wgan_gp", grad_penalty_weight=10.0,
        discriminator=toy_discriminator, real_data=real_data,
        fake_data=fake_data, gp_key=gp_key)
    loss_wgan = jax.block_until_ready(loss_wgan)

    gp_ref = _wgan_gradient_penalty(toy_discriminator, real_data, fake_data,
                                    gp_key)
    ref_wgan = (jnp.mean(output_fake) - jnp.mean(output_real)
                + 10.0 * gp_ref)
    assert jnp.allclose(loss_wgan, ref_wgan, rtol=1e-5, atol=1e-5), (
        loss_wgan, ref_wgan)

    print("KERNEL_OK")
</pallas_src>

<mosaic_0001>
module attributes {stable_mosaic.version = 11 : i64} {
  func.func @kernel(%arg0: memref<1x128xf32, #tpu.memory_space<vmem>>, %arg1: memref<1x128xf32, #tpu.memory_space<vmem>>, %arg2: memref<1x1xf32, #tpu.memory_space<smem>>) attributes {dimension_semantics = [], scalar_prefetch = 0 : i64, scratch_operands = 0 : i64, tpu.core_type = #tpu.core_type<tc>} {
    %c0 = arith.constant 0 : index
    %c0_0 = arith.constant 0 : index
    %0 = vector.load %arg0[%c0, %c0_0] : memref<1x128xf32, #tpu.memory_space<vmem>>, vector<1x128xf32>
    %c0_1 = arith.constant 0 : index
    %c0_2 = arith.constant 0 : index
    %1 = vector.load %arg1[%c0_1, %c0_2] : memref<1x128xf32, #tpu.memory_space<vmem>>, vector<1x128xf32>
    %cst = arith.constant 0.000000e+00 : f32
    %2 = vector.broadcast %cst : f32 to vector<1x128xf32>
    %3 = arith.maximumf %0, %2 : vector<1x128xf32>
    %4 = math.absf %0 : vector<1x128xf32>
    %cst_3 = arith.constant 0.000000e+00 : f32
    %5 = vector.broadcast %cst_3 : f32 to vector<1x128xf32>
    %6 = arith.subf %5, %4 : vector<1x128xf32>
    %7 = math.exp %6 : vector<1x128xf32>
    %8 = math.log1p %7 : vector<1x128xf32>
    %9 = arith.addf %3, %8 : vector<1x128xf32>
    %10 = tpu.iota {dimensions = array<i32: 1>} : vector<1x128xi32>
    %c8_i32 = arith.constant 8 : i32
    %11 = vector.broadcast %c8_i32 : i32 to vector<1x128xi32>
    %12 = arith.cmpi slt, %10, %11 : vector<1x128xi32>
    %cst_4 = arith.constant 0.000000e+00 : f32
    %13 = vector.broadcast %cst_4 : f32 to vector<1x128xf32>
    %14 = arith.select %12, %9, %13 : vector<1x128xi1>, vector<1x128xf32>
    %cst_5 = arith.constant 0.000000e+00 : f32
    %15 = vector.broadcast %cst_5 : f32 to vector<1x128xf32>
    %16 = arith.subf %15, %1 : vector<1x128xf32>
    %cst_6 = arith.constant 0.000000e+00 : f32
    %17 = vector.broadcast %cst_6 : f32 to vector<1x128xf32>
    %18 = arith.maximumf %16, %17 : vector<1x128xf32>
    %19 = math.absf %16 : vector<1x128xf32>
    %cst_7 = arith.constant 0.000000e+00 : f32
    %20 = vector.broadcast %cst_7 : f32 to vector<1x128xf32>
    %21 = arith.subf %20, %19 : vector<1x128xf32>
    %22 = math.exp %21 : vector<1x128xf32>
    %23 = math.log1p %22 : vector<1x128xf32>
    %24 = arith.addf %18, %23 : vector<1x128xf32>
    %25 = tpu.iota {dimensions = array<i32: 1>} : vector<1x128xi32>
    %c8_i32_8 = arith.constant 8 : i32
    %26 = vector.broadcast %c8_i32_8 : i32 to vector<1x128xi32>
    %27 = arith.cmpi slt, %25, %26 : vector<1x128xi32>
    %cst_9 = arith.constant 0.000000e+00 : f32
    %28 = vector.broadcast %cst_9 : f32 to vector<1x128xf32>
    %29 = arith.select %27, %24, %28 : vector<1x128xi1>, vector<1x128xf32>
    %30 = vector.shape_cast %14 : vector<1x128xf32> to vector<1x1x128xf32>
    %cst_10 = arith.constant dense<0.000000e+00> : vector<1xf32>
    %31 = vector.multi_reduction <add>, %30, %cst_10 [1, 2] : vector<1x1x128xf32> to vector<1xf32>
    %32 = vector.shape_cast %31 : vector<1xf32> to vector<1x1x1xf32>
    %33 = vector.extract %32[0, 0, 0] : f32 from vector<1x1x1xf32>
    %cst_11 = arith.constant 1.250000e-01 : f32
    %34 = arith.mulf %33, %cst_11 : f32
    %35 = vector.shape_cast %29 : vector<1x128xf32> to vector<1x1x128xf32>
    %cst_12 = arith.constant dense<0.000000e+00> : vector<1xf32>
    %36 = vector.multi_reduction <add>, %35, %cst_12 [1, 2] : vector<1x1x128xf32> to vector<1xf32>
    %37 = vector.shape_cast %36 : vector<1xf32> to vector<1x1x1xf32>
    %38 = vector.extract %37[0, 0, 0] : f32 from vector<1x1x1xf32>
    %cst_13 = arith.constant 1.250000e-01 : f32
    %39 = arith.mulf %38, %cst_13 : f32
    %40 = arith.addf %34, %39 : f32
    %c0_14 = arith.constant 0 : index
    %c0_15 = arith.constant 0 : index
    %41 = memref.load %arg2[%c0_14, %c0_15] : memref<1x1xf32, #tpu.memory_space<smem>>
    memref.store %40, %arg2[%c0_14, %c0_15] : memref<1x1xf32, #tpu.memory_space<smem>>
    return
  }
}

</mosaic_0001>

<bundles_post_ra>
// kernel: tpu_custom_call.1
= control target key start
LH: loop header
LB: loop body
LE: loop exit
PB: predicated region body
PF: predicated region fallthrough
CT: control target
= control target key end

     0   :  { %7 = vsyncpa [#allocation3], 0  ;;  %s196_s0 = inlined_call_operand.hbm [shape: f32[1,128], index: 0, kind: input, shape index: {}]   ;;  %s197_s1 = inlined_call_operand.vmem [shape: f32[1,128], index: 1, kind: input, shape index: {}]   ;;  %s198_s2 = inlined_call_operand.hbm [shape: f32[1,1], index: 2, kind: output, shape index: {}]  }
   0x1   :  { %8 = vsyncpa [#allocation4], 0  ;;  %s152_s9 = smov [#allocation2]   ;;  %s116_s13 = scalar_lea.hbm %s196_s0, 16 }
   0x2   :  { %s15_s10 = sshll.u32 %s152_s9, 4  ;;  %p117_p0 = scmp.ne.s32.totalorder %s196_s0, %s116_s13  ;;  %s16_s10 = int_to_ptr.vmem [resolvable:$true] %s15_s10 }
   0x3   :  { %p120_p1 = scmp.lt.u32.totalorder %s116_s13, %s196_s0 }
   0x5   :  { %p122_p2 = pnand %p120_p1, %p117_p0 }
   0x7   :  { %125 = shalt.err (!%p122_p2)
}
   0x8   :  { %s126_s18 = scalar_lea.vmem %s16_s10, 16  ;;  %s130_s19 = scalar_lea.vmem %s16_s10, 32 }
   0x9   :  { %p127_p3 = scmp.ne.s32.totalorder %s16_s10, %s126_s18  ;;  %p131_p4 = scmp.lt.s32.totalorder %s16_s10, %s16_s10 }
   0xa   :  { %p132_p5 = scmp.lt.s32.totalorder %s130_s19, %s126_s18 }
   0xc   :  { %p133_p6 = por %p132_p5, %p131_p4 }
   0xe   :  { %p134_p7 = pnand %p133_p6, %p127_p3 }
  0x10   :  { %137 = shalt.err (!%p134_p7)
}
  0x11   :  { %18 = dma.hbm_to_vmem [thread:$0]  %s196_s0, 16, %s16_s10, [#allocation3]  }
  0x12   :  { %148 = dma.done.wait [#allocation3], 16  }
  0x13   :  { %149 = vsyncadd [#allocation3], 4294967280  ;;  %v24_v0 = vld [vmem:[#allocation2] sm:$0x1]  ;;  %v41_v16 = vlaneseq  ;;  %vm62_vm3 = vcmask 1040384   ;;  %s138_s29 = scalar_lea.hbm %s198_s2, 16 }
  0x14   :  { %v25_v1 = vld [vmem:[%s197_s1] sm:$0x1]  ;;  %v27_v2 = vand.u32 2147483647, %v24_v0  ;;  %v26_v23 = vmax.f32 %v24_v0, 0.0  ;;  %p139_p8 = scmp.ne.s32.totalorder %s198_s2, %s138_s29  ;;  %p142_p9 = scmp.lt.u32.totalorder %s138_s29, %s198_s2 }
  0x15   :  { %v45_v3 = vsub.f32 0.0, %v25_v1  ;;  %v42_v21 = vand.u32 127, %v41_v16 }
  0x16   :  { %v28_v4 = vsub.f32 0.0, %v27_v2  ;;  %p144_p10 = pnand %p142_p9, %p139_p8 }
  0x17   :  { %v47_v5 = vand.u32 2147483647, %v45_v3  ;;  %v46_v27 = vmax.f32 %v45_v3, 0.0  ;;  %vm43_vm2 = vcmp.lt.s32.totalorder %v42_v21, 8 }
  0x18   :  { %v29_v6 = vmul.f32 1.442695, %v28_v4 }
  0x19   :  { %v48_v7 = vsub.f32 0.0, %v47_v5 }
  0x1a   :  { %108 = vpow2.f32 %v29_v6 }
  0x1b   :  { %v49_v8 = vmul.f32 1.442695, %v48_v7 }
  0x1d   :  { %110 = vpow2.f32 %v49_v8 }
  0x24   :  { %v109_v9 = vpop.eup %108 }
  0x25   :  { %v31_v10 = vadd.f32 1.0, %v109_v9  ;;  %v34_v13 = vmul.f32 -0.5, %v109_v9  ;;  %v37_v17 = vand.u32 2147483647, %v109_v9 }
  0x27   :  { %v111_v11 = vpop.eup %110  ;;  %112 = vlog2.f32 %v31_v10  ;;  %v35_v15 = vadd.f32 1.0, %v34_v13  ;;  %vm38_vm0 = vcmp.lt.f32.partialorder %v37_v17, 0.0004427343 }
  0x28   :  { %v51_v12 = vadd.f32 1.0, %v111_v11  ;;  %v54_v14 = vmul.f32 -0.5, %v111_v11  ;;  %v57_v19 = vand.u32 2147483647, %v111_v11 }
  0x29   :  { %v36_v20 = vmul.f32 %v109_v9, %v35_v15 }
  0x2a   :  { %114 = vlog2.f32 %v51_v12  ;;  %v55_v18 = vadd.f32 1.0, %v54_v14  ;;  %vm58_vm1 = vcmp.lt.f32.partialorder %v57_v19, 0.0004427343 }
  0x2c   :  { %v56_v25 = vmul.f32 %v111_v11, %v55_v18 }
  0x31   :  { %v113_v22 = vpop.eup %112 }
  0x32   :  { %v33_v24 = vmul.f32 0.6931472, %v113_v22 }
  0x34   :  { %v115_v26 = vpop.eup %114  ;;  %v39_v28 = vsel %vm38_vm0, %v36_v20, %v33_v24 }
  0x35   :  { %v53_v29 = vmul.f32 0.6931472, %v115_v26  ;;  %v40_v30 = vadd.f32 %v39_v28, %v26_v23 }
  0x37   :  { %v59_v31 = vsel %vm58_vm1, %v56_v25, %v53_v29  ;;  %v44_v32 = vsel %vm43_vm2, %v40_v30, 0.0 }
  0x38   :  { %v60_v33 = vadd.f32 %v59_v31, %v46_v27  ;;  %v63_v34 = vsel %vm62_vm3, %v44_v32, 0.0 }
  0x39   :  { %64 = vadd.xlane.f32.xlu0 %v63_v34 }
  0x3a   :  { %v61_v35 = vsel %vm43_vm2, %v60_v33, 0.0 }
  0x3b   :  { %v74_v36 = vsel %vm62_vm3, %v61_v35, 0.0 }
  0x3d   :  { %75 = vadd.xlane.f32.xlu0 %v74_v36 }
  0xc6   :  { %v65_v37 = vpop.xlane.xlu0 %64 }
  0xc7   :  { %v66_v38 = vrot.slane %v65_v37, 4 }
  0xc9   :  { %v67_v39 = vadd.f32 %v66_v38, %v65_v37 }
  0xca   :  { %v76_v40 = vpop.xlane.xlu0 %75 }
  0xcb   :  { %v68_v41 = vrot.slane %v67_v39, 2  ;;  %v77_v42 = vrot.slane %v76_v40, 4 }
  0xcd   :  { %v78_v43 = vadd.f32 %v77_v42, %v76_v40  ;;  %v69_v44 = vadd.f32 %v68_v41, %v67_v39 }
  0xcf   :  { %v79_v45 = vrot.slane %v78_v43, 2  ;;  %v70_v46 = vrot.slane %v69_v44, 1 }
  0xd1   :  { %v80_v47 = vadd.f32 %v79_v45, %v78_v43  ;;  %v71_v48 = vadd.f32 %v70_v46, %v69_v44 }
  0xd3   :  { %102 = vpush %v71_v48  ;;  %v81_v49 = vrot.slane %v80_v47, 1 }
  0xd5   :  { %v82_v50 = vadd.f32 %v81_v49, %v80_v47 }
  0xd7   :  { %104 = vpush %v82_v50 }
 0x104   :  { %s103_s0 = spop %102 }
 0x105   :  { %s73_s1 = smul.f32 0.125, %s103_s0 }
 0x108   :  { %s105_s24 = spop %104 }
 0x109   :  { %s84_s25 = smul.f32 0.125, %s105_s24 }
 0x10b   :  { %s85_s26 = sadd.f32 %s84_s25, %s73_s1 }
 0x10d   :  { %87 = sst [smem:[#allocation5]] %s85_s26 }
 0x10e   :  { %147 = shalt.err (!%p144_p10)
}
 0x10f   :  { %s153_s6 = smov [#allocation5]  }
 0x110   :  { %95 = dma.smem_to_hbm %s153_s6, 16, %s198_s2, [#allocation4]  }
 0x111   :  { %150 = dma.done.wait [#allocation4], 16  }
 0x112   :  { %151 = vsyncadd [#allocation4], 4294967280 }
 0x113   :  { %99 = sfence }
 0x114   :  { %100 = vsyncpa [#allocation3], 1 }
 0x115   :  { %101 = vsyncpa [#allocation4], 1 }

</bundles_post_ra>
